<compile_context>
chip_gen: v5e
topology: v5e:2x2
jax: 0.10.0
libtpu: 0.0.40
codegen_flags: <defaults>
</compile_context>

<pallas_src>
import math
import jax
import jax.numpy as jnp
from jax.experimental import pallas as pl
from jax.experimental.pallas import tpu as pltpu


def _pos_enc_kernel(x_ref, w_ref, pe_ref, o_ref):
    # x_ref:  (TR, P)  streaming row tile of the flattened (B*M*N, P) input
    # w_ref:  (P, D)   projection weight, grid-resident
    # pe_ref: (N, D)   positional encoding with the Linear bias folded in
    # o_ref:  (TR, D)
    TR, D = o_ref.shape
    N = pe_ref.shape[0]
    y = jnp.dot(x_ref[...], w_ref[...], preferred_element_type=jnp.float32)
    # In-kernel broadcast of the (N, D) encoding over the TR//N patch groups.
    # TR is always a multiple of N and every block starts at a multiple of N
    # rows, so the phase is exact. D stays in lanes -> cheap relayout.
    y = y.reshape(TR // N, N, D) + pe_ref[...][None, :, :]
    o_ref[...] = y.reshape(TR, D).astype(o_ref.dtype)


def _cdiv(a, b):
    return -(-a // b)


def _pick_tile_rows(R, N, target_rows=8192):
    """Row-tile height TR.

    Invariants:
      * TR is a multiple of N (pos-encoding period) so the in-kernel
        (TR//N, N, D) broadcast is exact and blocks start on patch boundaries.
      * TR is a multiple of 8 (sublane alignment) unless TR == R (full-extent
        blocks are exempt from the (8, 128) divisibility rule).
      * TR never exceeds R; the grid has >= 2 steps (preferably an even count)
        whenever R allows, so both v7x TensorCores stay busy.
    The last block may be partial (R need not be a multiple of TR); Pallas
    masks the out-of-bounds rows — no full-extent fallback.
    """
    step = N * 8 // math.gcd(N, 8)          # lcm(N, 8)
    if R <= step:
        return R                            # single full-extent block; R % N == 0 by construction
    units = _cdiv(R, step)                  # step-sized units covering R (>= 2 here)
    u = max(1, min(target_rows // step, units))
    if _cdiv(units, u) < 2:                 # keep at least 2 grid steps
        u = _cdiv(units, 2)
    if _cdiv(units, u) % 2 == 1:            # prefer an even step count (v7x megacore)
        for cand in range(u, max(0, u - 4), -1):
            if _cdiv(units, cand) % 2 == 0:
                u = cand
                break
    return u * step


def positional_encoding_forward(x, w, b, pos_encoding, *,
                                target_rows=8192, operand_dtype=None):
    """x: (B, M, N, P); w: (P, D); b: (D,); pos_encoding: (N, D) -> (B, M, N, D).

    `operand_dtype` (e.g. jnp.bfloat16) optionally casts x/w at the call
    boundary for mem-bound deployments; accumulation stays f32 and the output
    keeps x's original dtype.
    """
    B, M, N, P = x.shape
    D = w.shape[1]
    R = B * M * N
    out_dtype = x.dtype

    xf = x.reshape(R, P)                    # free HBM reshape (merge leading dims)
    if operand_dtype is not None:
        xf = xf.astype(operand_dtype)
        w = w.astype(operand_dtype)

    # Fold the Linear bias into the positional encoding once (f32, wrapper-side).
    pe_b = pos_encoding.astype(jnp.float32) + b.astype(jnp.float32)[None, :]

    TR = _pick_tile_rows(R, N, target_rows)
    grid = (pl.cdiv(R, TR),)

    # VMEM budget: x's minor dim is lane-padded to 128 in VMEM; streaming
    # x/out blocks are double-buffered, w/pe are tiny grid-residents.
    def _ru(v, m):
        return -(-v // m) * m
    x_blk = TR * _ru(P, 128) * jnp.dtype(xf.dtype).itemsize
    out_blk = TR * _ru(D, 128) * jnp.dtype(out_dtype).itemsize
    w_blk = _ru(P, 8) * _ru(D, 128) * jnp.dtype(w.dtype).itemsize
    pe_blk = _ru(N, 8) * _ru(D, 128) * 4
    vmem_limit = max(2 * (x_blk + out_blk + w_blk + pe_blk) + (4 << 20), 32 << 20)

    bytes_accessed = (xf.size * xf.dtype.itemsize
                      + w.size * jnp.dtype(w.dtype).itemsize
                      + pe_b.size * pe_b.dtype.itemsize
                      + R * D * jnp.dtype(out_dtype).itemsize)

    out = pl.pallas_call(
        _pos_enc_kernel,
        out_shape=jax.ShapeDtypeStruct((R, D), out_dtype),
        grid_spec=pltpu.PrefetchScalarGridSpec(
            num_scalar_prefetch=0,
            grid=grid,
            in_specs=[
                pl.BlockSpec((TR, P), lambda i: (i, 0)),   # streaming row tile of x
                pl.BlockSpec((P, D), lambda i: (0, 0)),    # weight (grid-resident)
                pl.BlockSpec((N, D), lambda i: (0, 0)),    # pe + bias (grid-resident, not TR-scaled)
            ],
            out_specs=pl.BlockSpec((TR, D), lambda i: (i, 0)),
        ),
        compiler_params=pltpu.CompilerParams(
            dimension_semantics=("parallel",),
            vmem_limit_bytes=int(vmem_limit)),
        cost_estimate=pl.CostEstimate(
            flops=2 * R * P * D,
            transcendentals=0,
            bytes_accessed=int(bytes_accessed)),
    )(xf, w, pe_b)

    return out.reshape(B, M, N, D)


def init_params(key, patch_dim, d_model, num_patches, dtype=jnp.float32):
    """Deterministic parameter init mirroring the PyTorch module __init__."""
    k_w, k_b, k_pe = jax.random.split(key, 3)
    # nn.Linear weight: (d_model, patch_dim), xavier_uniform_.
    limit = math.sqrt(6.0 / (patch_dim + d_model))
    w_pt = jax.random.uniform(k_w, (d_model, patch_dim), dtype,
                              minval=-limit, maxval=limit)
    w = w_pt.T  # store as (P, D) for the kernel
    # nn.Linear bias default init: U(-1/sqrt(fan_in), 1/sqrt(fan_in)).
    bound = 1.0 / math.sqrt(patch_dim)
    b = jax.random.uniform(k_b, (d_model,), dtype, minval=-bound, maxval=bound)
    # pos_encoding: U(-0.02, 0.02), shape (num_patches, d_model).
    pe = jax.random.uniform(k_pe, (num_patches, d_model), dtype,
                            minval=-0.02, maxval=0.02)
    return w, b, pe


if __name__ == "__main__":
    # Small shapes consistent with the module (module defaults: P=16, D=128).
    B, M, N, P, D = 2, 4, 16, 16, 128  # batch, channels, num_patches, patch_dim, d_model

    key = jax.random.PRNGKey(0)
    k_x, k_x2, k_params = jax.random.split(key, 3)
    x = jax.random.normal(k_x, (B, M, N, P), dtype=jnp.float32)
    w, b, pe = init_params(k_params, patch_dim=P, d_model=D, num_patches=N)

    out = jax.block_until_ready(positional_encoding_forward(x, w, b, pe))
    ref = (x.reshape(B * M, N, P) @ w + b[None, None, :]
           + pe[None, :, :]).reshape(B, M, N, D)
    assert out.shape == (B, M, N, D)
    assert jnp.allclose(out, ref, atol=1e-4, rtol=1e-4)

    # Robustness check: R not a multiple of the chosen tile -> partial last
    # block path (previously the biggest perf/robustness cliff).
    B2, M2 = 3, 1
    x2 = jax.random.normal(k_x2, (B2, M2, N, P), dtype=jnp.float32)
    out2 = jax.block_until_ready(positional_encoding_forward(x2, w, b, pe))
    ref2 = (x2.reshape(B2 * M2, N, P) @ w + b[None, None, :]
            + pe[None, :, :]).reshape(B2, M2, N, D)
    assert jnp.allclose(out2, ref2, atol=1e-4, rtol=1e-4)

    print("KERNEL_OK")
</pallas_src>

<mosaic_0001>
module attributes {stable_mosaic.version = 11 : i64} {
  func.func @_pos_enc_kernel(%arg0: i32, %arg1: memref<64x16xf32, #tpu.memory_space<vmem>>, %arg2: memref<16x128xf32, #tpu.memory_space<vmem>>, %arg3: memref<16x128xf32, #tpu.memory_space<vmem>>, %arg4: memref<64x128xf32, #tpu.memory_space<vmem>>) attributes {dimension_semantics = [#tpu.dimension_semantics<parallel>], iteration_bounds = array<i64: 2>, scalar_prefetch = 0 : i64, scratch_operands = 0 : i64, tpu.core_type = #tpu.core_type<tc>, window_params = [{transform_indices = @transform_0, window_bounds = array<i64: 64, 16>}, {pipeline_mode = #tpu.pipeline_mode<synchronous>, transform_indices = @transform_1, window_bounds = array<i64: 16, 128>}, {pipeline_mode = #tpu.pipeline_mode<synchronous>, transform_indices = @transform_2, window_bounds = array<i64: 16, 128>}, {transform_indices = @transform_3, window_bounds = array<i64: 64, 128>}]} {
    %c0 = arith.constant 0 : index
    %c0_0 = arith.constant 0 : index
    %0 = vector.load %arg1[%c0, %c0_0] : memref<64x16xf32, #tpu.memory_space<vmem>>, vector<64x16xf32>
    %c0_1 = arith.constant 0 : index
    %c0_2 = arith.constant 0 : index
    %1 = vector.load %arg2[%c0_1, %c0_2] : memref<16x128xf32, #tpu.memory_space<vmem>>, vector<16x128xf32>
    %cst = arith.constant dense<0.000000e+00> : vector<64x128xf32>
    %2 = tpu.matmul %0, %1, %cst {dimension_numbers = #tpu.dot_dimension_numbers<[1], [0], [0], [1], [0, 0, 1, 1], [], []>} : vector<64x16xf32>, vector<16x128xf32>, vector<64x128xf32> -> vector<64x128xf32>
    %3 = vector.shape_cast %2 : vector<64x128xf32> to vector<4x16x128xf32>
    %c0_3 = arith.constant 0 : index
    %c0_4 = arith.constant 0 : index
    %4 = vector.load %arg3[%c0_3, %c0_4] : memref<16x128xf32, #tpu.memory_space<vmem>>, vector<16x128xf32>
    %5 = vector.shape_cast %4 : vector<16x128xf32> to vector<1x16x128xf32>
    %6 = vector.broadcast %5 : vector<1x16x128xf32> to vector<4x16x128xf32>
    %7 = arith.addf %3, %6 : vector<4x16x128xf32>
    %8 = vector.shape_cast %7 : vector<4x16x128xf32> to vector<64x128xf32>
    %c0_5 = arith.constant 0 : index
    %c0_6 = arith.constant 0 : index
    %9 = vector.load %arg4[%c0_5, %c0_6] : memref<64x128xf32, #tpu.memory_space<vmem>>, vector<64x128xf32>
    tpu.vector_store %arg4[%c0_5, %c0_6], %8 {strides = array<i32>} : memref<64x128xf32, #tpu.memory_space<vmem>>, vector<64x128xf32>,
    return
  }
  func.func @transform_0(%arg0: i32) -> (i32, i32) {
    %c0_i32 = arith.constant 0 : i32
    %c0_i32_0 = arith.constant 0 : i32
    return %arg0, %c0_i32 : i32, i32
  }
  func.func @transform_1(%arg0: i32) -> (i32, i32) {
    %c0_i32 = arith.constant 0 : i32
    %c0_i32_0 = arith.constant 0 : i32
    %c0_i32_1 = arith.constant 0 : i32
    return %c0_i32, %c0_i32_0 : i32, i32
  }
  func.func @transform_2(%arg0: i32) -> (i32, i32) {
    %c0_i32 = arith.constant 0 : i32
    %c0_i32_0 = arith.constant 0 : i32
    %c0_i32_1 = arith.constant 0 : i32
    return %c0_i32, %c0_i32_0 : i32, i32
  }
  func.func @transform_3(%arg0: i32) -> (i32, i32) {
    %c0_i32 = arith.constant 0 : i32
    %c0_i32_0 = arith.constant 0 : i32
    return %arg0, %c0_i32 : i32, i32
  }
}

</mosaic_0001>

<bundles_post_ra>
// kernel: tpu_custom_call.1
= control target key start
LH: loop header
LB: loop body
LE: loop exit
PB: predicated region body
PF: predicated region fallthrough
CT: control target
= control target key end

     0   :  { %8 = vsyncpa [#allocation3], 0  ;;  %s606_s0 = inlined_call_operand.vmem [shape: f32[128,16], index: 0, kind: input, shape index: {}]   ;;  %s607_s1 = inlined_call_operand.vmem [shape: f32[16,128], index: 1, kind: input, shape index: {}]   ;;  %s608_s2 = inlined_call_operand.vmem [shape: f32[16,128], index: 2, kind: input, shape index: {}]   ;;  %s609_s3 = inlined_call_operand.hbm [shape: f32[128,128], index: 3, kind: output, shape index: {}]  }
   0x1   :  { %10 = vsyncpa [#allocation3 + $0x1], 0  ;;  %s498_s12 = smov 0   ;;  %s500_s13 = smov 0  }
   0x2   :  { %s502_s14 = smov 0   ;;  %s504_s15 = smov 0  }
   0x3 LB: > { %s519_s16 = sadd.s32 4294967295, %s474_s15   ;;  %s344_s17 = sadd.s32 4294967294, %s474_s15   ;;  %s474_s15 = sphi %s504_s15, %s615_s15   ;;  %s470_s14 = sphi %s502_s14, %s614_s14   ;;  %s466_s13 = sphi %s500_s13, %s613_s13   ;;  %s462_s12 = sphi %s498_s12, %s612_s12  }
   0x4   : > { %s523_s18 = sadd.s32 1, %s474_s15   ;;  %s91_s19 = sadd.s32 1, %s470_s14 }
   0x5   : > { %s88_s20 = ssub.s32 %s474_s15, %s523_s18  ;;  %p101_p0 = scmp.ne.s32.totalorder %s470_s14, %s466_s13 }
   0x6   : > { %p89_p1 = scmp.eq.s32.totalorder %s88_s20, 0  ;;  %p102_p2 = scmp.eq.s32.totalorder %s519_s16, 1 }
   0x7   : > { %p107_p3 = scmp.ne.s32.totalorder %s466_s13, %s462_s12  ;;  %p108_p4 = scmp.eq.s32.totalorder %s344_s17, 1 }
   0x8   : > { %s534_s21 = scalar_select %p89_p1, %s470_s14, %s91_s19  }
   0x9   : > { %p536_p5 = por %p102_p2, %p101_p0  ;;  %p540_p6 = por %p108_p4, %p107_p3 }
   0xa   : > { %p347_p7 = scmp.ge.s32.totalorder %s474_s15, 1  ;;  %p141_p8 = scmp.lt.s32.totalorder %s474_s15, 3 }
   0xc   : > { %p142_p9 = pnand %p347_p7, %p141_p8 }
   0xd   : > { %s349_s28 = sshll.u32 (!%p142_p9), %s519_s16, 3  ;;  %s162_s6 = sand.u32 (!%p142_p9), 1, %s466_s13  }
   0xe   : > { %145 = sbr.rel (%p142_p9) target bundleno = 171 (0xab), region = 32  ;;  %p166_p10 = scmp.lt.s32.totalorder (!%p142_p9), %s349_s28, 15 }
   0xf   : > { %s348_s7 = sshll.u32 (!%p142_p9), %s162_s6, 6  ;;  %s364_s11 = sshll.u32 (!%p142_p9), %s519_s16, 6 }
  0x10   : > { %s164_s10 = scalar_lea.vmem (!%p142_p9), [#allocation2], %s348_s7  ;;  %s278_s25 = scalar_lea.hbm (!%p142_p9), %s609_s3, %s364_s11 }
  0x11   : > { %s279_s26 = sshll.u32 (!%p142_p9), %s164_s10, 4  ;;  %s281_s16 = sshll.u32 (!%p142_p9), %s278_s25, 4  ;;  %s280_s26 = int_to_ptr.vmem [resolvable:$true] %s279_s26  ;;  %s282_s16 = int_to_ptr.hbm [resolvable:$true] %s281_s16 }
  0x12   : > { %s267_s27 = scalar_lea.sflag (!%p142_p9), [#allocation3], %s162_s6 }
  0x13   : > { %v181_v0 = vld [vmem:[%s607_s1 + $0x8] sm:$0xff]  ;;  %v180_v1 = vld [vmem:[%s607_s1] sm:$0xff]  ;;  %s617_s28 = smov (!%p166_p10, %s349_s28), 15  ;;  %vm182_vm0 = vcmask 130048  }
  0x14   : > { %366 = vmatpush.msra.mxu2 %v181_v0  ;;  %367 = vmatpush.msra.mxu3 %v181_v0  ;;  %s350_s29 = sshll.u32 %s617_s28, 3  ;;  %v248_v10 = vld [vmem:[%s608_s2] sm:$0xff]  ;;  %v249_v19 = vld [vmem:[%s608_s2 + $0x8] sm:$0xff]  ;;  %s426_s28 = sshra.s32 %s282_s16, 4  ;;  %s427_s28 = int_to_ptr.hbm [resolvable:$true] %s426_s28 }
  0x15   : > { %221 = vmatpush.msra.mxu0 %v181_v0  ;;  %365 = vmatpush.msra.mxu1 %v181_v0  ;;  %s169_s5 = scalar_lea.vmem %s606_s0, %s350_s29  ;;  %s428_s29 = scalar_lea.hbm %s427_s28, 64 }
  0x16   : > { %369 = vmatpush.msra.mxu2 %v180_v1  ;;  %370 = vmatpush.msra.mxu3 %v180_v1  ;;  %v176_v2 = vld [vmem:[%s169_s5 + $0x20] sm:$0xff]  ;;  %v178_v3 = vld [vmem:[%s169_s5 + $0x30] sm:$0xff]  ;;  %v177_v6 = vld [vmem:[%s169_s5 + $0x28] sm:$0xff]  ;;  %p429_p11 = scmp.ne.s32.totalorder %s427_s28, %s428_s29  ;;  %p433_p0 = scmp.lt.s32.totalorder %s427_s28, %s609_s3 }
  0x17   : > { %222 = vmatpush.msra.mxu0 %v180_v1  ;;  %368 = vmatpush.msra.mxu1 %v180_v1  ;;  %v172_v4 = vld [vmem:[%s169_s5] sm:$0xff]  ;;  %v174_v5 = vld [vmem:[%s169_s5 + $0x10] sm:$0xff]  ;;  %v179_v7 = vld [vmem:[%s169_s5 + $0x38] sm:$0xff] }
  0x18   : > { %355 = vmatmul.msk.f32.vlgmr.msra.gmra.mxu2 %vm182_vm0, %v176_v2  ;;  %357 = vmatmul.msk.f32.vlgmr.msra.gmra.mxu3 %vm182_vm0, %v178_v3  ;;  %v173_v8 = vld [vmem:[%s169_s5 + $0x8] sm:$0xff]  ;;  %v175_v9 = vld [vmem:[%s169_s5 + $0x18] sm:$0xff]  ;;  %p430_p12 = pnand %p429_p11, %p536_p5  ;;  %s432_s5 = scalar_lea.hbm %s609_s3, 128 }
  0x19   : > { %351 = vmatmul.msk.f32.vlgmr.msra.gmra.mxu0 %vm182_vm0, %v172_v4  ;;  %353 = vmatmul.msk.f32.vlgmr.msra.gmra.mxu1 %vm182_vm0, %v174_v5  ;;  %p434_p1 = scmp.lt.s32.totalorder %s432_s5, %s428_s29 }
  0x1a   : > { %p431_p13 = pneg %p430_p12 }
  0x1b   : > { %p435_p2 = por %p434_p1, %p433_p0 }
  0x1d   : > { %p436_p3 = pnand %p435_p2, %p431_p13 }
  0x20   : > { %356 = vmatmul.msk.f32.gmra.mxu2 %vm182_vm0, %v177_v6  ;;  %358 = vmatmul.msk.f32.gmra.mxu3 %vm182_vm0, %v179_v7 }
  0x21   : > { %352 = vmatmul.msk.f32.gmra.mxu0 %vm182_vm0, %v173_v8  ;;  %354 = vmatmul.msk.f32.gmra.mxu1 %vm182_vm0, %v175_v9 }
  0x96   : > { %v224_v11 = vpop.f32.mrf.mxu0  ;;  %v230_v12 = vpop.f32.mrf.mxu1 }
  0x97   : > { %v250_v13 = vadd.f32 %v248_v10, %v224_v11  ;;  %v252_v14 = vadd.f32 %v248_v10, %v230_v12 }
  0x99   : > { %258 = vst [vmem:[%s164_s10] sm:$0xff] %v250_v13 }
  0x9a   : > { %260 = vst [vmem:[%s164_s10 + $0x10] sm:$0xff] %v252_v14 }
  0x9b   : > { %v236_v15 = vpop.f32.mrf.mxu2  ;;  %v242_v16 = vpop.f32.mrf.mxu3 }
  0x9c   : > { %v254_v17 = vadd.f32 %v248_v10, %v236_v15  ;;  %v256_v18 = vadd.f32 %v248_v10, %v242_v16 }
  0x9e   : > { %262 = vst [vmem:[%s164_s10 + $0x20] sm:$0xff] %v254_v17  ;;  %v227_v20 = vpop.f32.mrf.mxu0  ;;  %v233_v21 = vpop.f32.mrf.mxu1 }
  0x9f   : > { %264 = vst [vmem:[%s164_s10 + $0x30] sm:$0xff] %v256_v18  ;;  %v251_v22 = vadd.f32 %v249_v19, %v227_v20  ;;  %v253_v23 = vadd.f32 %v249_v19, %v233_v21 }
  0xa1   : > { %259 = vst [vmem:[%s164_s10 + $0x8] sm:$0xff] %v251_v22 }
  0xa2   : > { %261 = vst [vmem:[%s164_s10 + $0x18] sm:$0xff] %v253_v23 }
  0xa3   : > { %v239_v24 = vpop.f32.mrf.mxu2  ;;  %v245_v25 = vpop.f32.mrf.mxu3 }
  0xa4   : > { %v255_v26 = vadd.f32 %v249_v19, %v239_v24  ;;  %v257_v27 = vadd.f32 %v249_v19, %v245_v25 }
  0xa6   : > { %263 = vst [vmem:[%s164_s10 + $0x28] sm:$0xff] %v255_v26 }
  0xa7   : > { %265 = vst [vmem:[%s164_s10 + $0x38] sm:$0xff] %v257_v27 }
  0xa8   : > { %439 = shalt.err (!%p436_p3)
}
  0xa9   : > { %s476_s6 = smov 128   ;;  %s477_s9 = smov 8  }
  0xaa   : > { %371 = dma.vmem_to_hbm [thread:$0]  (%p536_p5), %s280_s26, 1024, %s282_s16, %s267_s27, %s476_s6, %s476_s6, %s477_s9  }
  0xab PF: > { %p377_p4 = scmp.ge.s32.totalorder %s474_s15, 2  ;;  %s296_s10 = sand.u32 1, %s462_s12  }
  0xac   : > { %s297_s11 = scalar_lea.sflag [#allocation3], %s296_s10 }
  0xad   : > { %p374_p7 = pnand %p377_p4, %p540_p6 }
  0xaf   : > { %p375_p8 = pneg %p374_p7 }
  0xb1   : > { %457 = dma.done.wait (%p375_p8), %s297_s11, 1024  }
  0xb2   : > { %459 = vsyncadd (%p375_p8), %s297_s11, 4294966272  ;;  %p13_p9 = scmp.ge.s32.totalorder %s523_s18, 4   ;;  %s612_s12 = smov %s466_s13 }
  0xb3   : > { %s613_s13 = smov %s470_s14  ;;  %s614_s14 = smov %s534_s21 }
  0xb4   : > { %s615_s15 = smov %s523_s18  ;;  %15 = sbr.rel (!%p13_p9) target bundleno = 3 (0x3), region = 67 }
  0xb9   :  { %303 = vsyncpa [#allocation3], 1 }
  0xba   :  { %305 = vsyncpa [#allocation3 + $0x1], 1 }

</bundles_post_ra>
